<compile_context>
chip_gen: v6e
topology: v6e:2x2x1
jax: 0.10.0
libtpu: 0.0.40
codegen_flags: <defaults>
</compile_context>

<pallas_src>
import math
import functools

import jax
import jax.numpy as jnp
from jax.experimental import pallas as pl
from jax.experimental.pallas import tpu as pltpu


# ---------------------------------------------------------------------------
# Pallas kernel
# ---------------------------------------------------------------------------
def _pos_enc_kernel(x_ref, pe_ref, o_ref, *, batch):
    # x_ref : [block_s, B*E]  flattened activation tile (fully dense vregs)
    # pe_ref: [block_s, E]    positional rows for the same seq block
    pe_tiled = jnp.tile(pe_ref[...], (1, batch))          # [block_s, B*E]
    o_ref[...] = (x_ref[...] + pe_tiled).astype(o_ref.dtype)
    # TODO(synk): training-mode dropout (pltpu.prng_seed / prng_random_bits
    # mask-and-scale) not implemented; eval-mode identity only.


# ---------------------------------------------------------------------------
# "Module init": build the pe buffer exactly like PyTorch register_buffer
# ---------------------------------------------------------------------------
def build_pe_buffer(d_model, max_len=5000):
    position = jnp.arange(max_len, dtype=jnp.float32)[:, None]                  # [max_len, 1]
    div_term = jnp.exp(
        jnp.arange(0, d_model, 2, dtype=jnp.float32) * (-math.log(10000.0) / d_model)
    )                                                                            # [d_model/2]
    pe_sin = jnp.sin(position * div_term)                                        # even lanes
    pe_cos = jnp.cos(position * div_term)                                        # odd lanes
    pe = jnp.stack([pe_sin, pe_cos], axis=-1).reshape(max_len, d_model)          # interleave
    return pe[:, None, :]                                                        # [max_len, 1, d_model]


# ---------------------------------------------------------------------------
# Forward wrapper
# ---------------------------------------------------------------------------
def positional_encoding(x, pe, *, block_s=None, vmem_budget_bytes=32 * 1024 * 1024):
    """x: [S, B, E], pe: [max_len, 1, E] -> x + pe[:S]  (dropout = identity / eval)."""
    S, B, E = x.shape
    assert pe.shape[0] >= S and pe.shape[1] == 1 and pe.shape[2] == E

    # Lane-dense 2D layouts (metadata-only reshapes; no data movement).
    x2d = x.reshape(S, B * E)                                   # [S, B*E]
    pe2d = jnp.asarray(pe[:S, 0, :], dtype=x.dtype)             # [S, E]

    if block_s is None:
        # Per-row bytes: x + out double-buffered, pe double-buffered.
        itemsize = jnp.dtype(x.dtype).itemsize
        bytes_per_row = (2 * (B * E) * 2 + E * 2) * itemsize
        cap = vmem_budget_bytes // max(bytes_per_row, 1)
        cap = max(8, min(2048, (cap // 8) * 8))                 # multiple of 8 sublanes
        block_s = S if S <= cap else cap                        # small S -> one block
    grid = (pl.cdiv(S, block_s),)

    out2d = pl.pallas_call(
        functools.partial(_pos_enc_kernel, batch=B),
        grid=grid,
        in_specs=[
            pl.BlockSpec((block_s, B * E), lambda i: (i, 0)),   # dense [block_s, B*E]
            pl.BlockSpec((block_s, E), lambda i: (i, 0)),       # matching pe rows, 1x per row
        ],
        out_specs=pl.BlockSpec((block_s, B * E), lambda i: (i, 0)),
        out_shape=jax.ShapeDtypeStruct((S, B * E), x.dtype),
        compiler_params=pltpu.CompilerParams(
            dimension_semantics=("parallel",),                  # seq blocks independent -> v7x dual-TC
        ),
    )(x2d, pe2d)
    return out2d.reshape(S, B, E)


# ---------------------------------------------------------------------------
# Main
# ---------------------------------------------------------------------------
if __name__ == "__main__":
    d_model = 128          # lane-dense last dim
    max_len = 5000         # PyTorch default buffer length
    S, B = 16, 2           # seq_len, batch (small demo shapes)

    key = jax.random.PRNGKey(0)
    x = jax.random.normal(key, (S, B, d_model), dtype=jnp.float32)
    pe = build_pe_buffer(d_model, max_len)

    fwd = jax.jit(positional_encoding)     # block_s auto -> single block, grid=(1,)
    out = fwd(x, pe)
    jax.block_until_ready(out)

    # Reference (pure JAX) check of the module semantics: dropout(eval) == identity.
    ref = x + pe[:S]
    assert out.shape == (S, B, d_model)
    assert bool(jnp.all(jnp.isfinite(out)))
    assert bool(jnp.allclose(out, ref, rtol=1e-6, atol=1e-6))

    print("KERNEL_OK")
</pallas_src>

<mosaic_0001>
module attributes {stable_mosaic.version = 11 : i64} {
  func.func @_pos_enc_kernel(%arg0: i32, %arg1: memref<16x256xf32, #tpu.memory_space<vmem>>, %arg2: memref<16x128xf32, #tpu.memory_space<vmem>>, %arg3: memref<16x256xf32, #tpu.memory_space<vmem>>) attributes {dimension_semantics = [#tpu.dimension_semantics<parallel>], iteration_bounds = array<i64: 1>, scalar_prefetch = 0 : i64, scratch_operands = 0 : i64, tpu.core_type = #tpu.core_type<tc>, window_params = [{transform_indices = @transform_0, window_bounds = array<i64: 16, 256>}, {transform_indices = @transform_1, window_bounds = array<i64: 16, 128>}, {transform_indices = @transform_2, window_bounds = array<i64: 16, 256>}]} {
    %c0 = arith.constant 0 : index
    %c0_0 = arith.constant 0 : index
    %0 = vector.load %arg2[%c0, %c0_0] : memref<16x128xf32, #tpu.memory_space<vmem>>, vector<16x128xf32>
    %1 = tpu.concatenate %0, %0 in 1 : vector<16x128xf32>, vector<16x128xf32> -> vector<16x256xf32>
    %c0_1 = arith.constant 0 : index
    %c0_2 = arith.constant 0 : index
    %2 = vector.load %arg1[%c0_1, %c0_2] : memref<16x256xf32, #tpu.memory_space<vmem>>, vector<16x256xf32>
    %3 = arith.addf %2, %1 : vector<16x256xf32>
    %c0_3 = arith.constant 0 : index
    %c0_4 = arith.constant 0 : index
    %4 = vector.load %arg3[%c0_3, %c0_4] : memref<16x256xf32, #tpu.memory_space<vmem>>, vector<16x256xf32>
    tpu.vector_store %arg3[%c0_3, %c0_4], %3 {strides = array<i32>} : memref<16x256xf32, #tpu.memory_space<vmem>>, vector<16x256xf32>,
    return
  }
  func.func @transform_0(%arg0: i32) -> (i32, i32) {
    %c0_i32 = arith.constant 0 : i32
    %c0_i32_0 = arith.constant 0 : i32
    return %arg0, %c0_i32 : i32, i32
  }
  func.func @transform_1(%arg0: i32) -> (i32, i32) {
    %c0_i32 = arith.constant 0 : i32
    %c0_i32_0 = arith.constant 0 : i32
    return %arg0, %c0_i32 : i32, i32
  }
  func.func @transform_2(%arg0: i32) -> (i32, i32) {
    %c0_i32 = arith.constant 0 : i32
    %c0_i32_0 = arith.constant 0 : i32
    return %arg0, %c0_i32 : i32, i32
  }
}

</mosaic_0001>

<bundles_post_ra>
// kernel: positional_encoding.1
= control target key start
LH: loop header
LB: loop body
LE: loop exit
PB: predicated region body
PF: predicated region fallthrough
CT: control target
= control target key end

     0   :  { %s74_s0 = inlined_call_operand.vmem [shape: f32[16,256], index: 0, kind: input, shape index: {}]   ;;  %s75_s1 = inlined_call_operand.vmem [shape: f32[16,128], index: 1, kind: input, shape index: {}]   ;;  %s76_s2 = inlined_call_operand.vmem [shape: f32[16,256], index: 2, kind: output, shape index: {}]  }
   0x1   :  { %v11_v0 = vld [vmem:[%s75_s1] sm:$0xff]  ;;  %v14_v2 = vld [vmem:[%s74_s0 + $0x8] sm:$0xff]  ;;  %v15_v6 = vld [vmem:[%s74_s0 + $0x10] sm:$0xff] }
   0x2   :  { %v13_v1 = vld [vmem:[%s74_s0] sm:$0xff]  ;;  %v18_v4 = vadd.f32 %v14_v2, %v11_v0  ;;  %v12_v5 = vld [vmem:[%s75_s1 + $0x8] sm:$0xff]  ;;  %v16_v7 = vld [vmem:[%s74_s0 + $0x18] sm:$0xff] }
   0x3   :  { %v17_v3 = vadd.f32 %v13_v1, %v11_v0  ;;  %v19_v8 = vadd.f32 %v15_v6, %v12_v5  ;;  %v20_v9 = vadd.f32 %v16_v7, %v12_v5 }
   0x4   :  { %22 = vst [vmem:[%s76_s2 + $0x8] sm:$0xff] %v18_v4 }
   0x5   :  { %21 = vst [vmem:[%s76_s2] sm:$0xff] %v17_v3  ;;  %23 = vst [vmem:[%s76_s2 + $0x10] sm:$0xff] %v19_v8 }
   0x6   :  { %24 = vst [vmem:[%s76_s2 + $0x18] sm:$0xff] %v20_v9 }

</bundles_post_ra>
